<compile_context>
chip_gen: v7x
topology: tpu7x:2x2x1
jax: 0.10.0
libtpu: 0.0.40
codegen_flags: <defaults>
</compile_context>

<pallas_src>
import jax
import jax.numpy as jnp
from jax import lax
from jax.experimental import pallas as pl
from jax.experimental.pallas import tpu as pltpu


def _fused_band_weights(w, width, dtype):
    """Fold kw taps + Cin contraction into one K-fused banded matrix.

    w: (3, 3, Cin, Cout) (kh, kw, ci, co).  Returns Wf of shape
    (3*width*Cin, width*Cout) with
        Wf[kh*width*Cin + c*Cin + ci, o*Cout + co] = w[kh, c - o + 1, ci, co]
    for |c - o| <= 1, else 0.  With lhs[m, kh*width*Cin + c*Cin + ci] holding
    input row (h + kh - 1), column c, channel ci (zero when out of range), a
    single matmul lhs @ Wf computes the full 3x3 'same' convolution.  The
    always-zero padding-column rows are dropped (they contribute nothing).
    """
    kh_n, kw_n, cin, cout = w.shape
    bands = []
    for kh in range(kh_n):
        m = jnp.zeros((width * cin, width * cout), jnp.float32)
        for kw in range(kw_n):
            # sel[c, o] = 1  iff  c = o + kw - 1   (diag offset k = 1 - kw)
            sel = jnp.eye(width, width, k=1 - kw, dtype=jnp.float32)
            m = m + jnp.kron(sel, w[kh, kw].astype(jnp.float32))
        bands.append(m)
    return jnp.concatenate(bands, axis=0).astype(dtype)


def _choose_bn(n, h, target_m=256):
    """Images per grid step: aim for M = bn*h ~ target_m, keep >= 2 steps."""
    bn = max(1, min(n, target_m // max(h, 1)))
    if n >= 2:
        bn = min(bn, -(-n // 2))  # keep >= 2 grid steps for v7x's 2 TCs
    return bn


def _make_fused_kernel(Bn, H, W, Cin, Cout, cdt):
    """Fused (conv3x3 + ReLU) x2 over Bn images per grid step."""
    wc_in = W * Cin
    wc_out = W * Cout

    def kernel(x_ref, wf1_ref, b1_ref, wf2_ref, b2_ref, o_ref,
               xcat_ref, ycat_ref):
        # x_ref    : (Bn, H, W*Cin)        row-flattened NHWC images
        # wf1_ref  : (3*W*Cin,  W*Cout)    K-fused banded conv1 weights
        # b1_ref   : (1, W*Cout)           bias tiled along W (f32)
        # wf2_ref  : (3*W*Cout, W*Cout)    K-fused banded conv2 weights
        # b2_ref   : (1, W*Cout)
        # o_ref    : (Bn, H, W*Cout)       lane-dense output (128 lanes)
        # xcat_ref : VMEM (Bn, H, 3*W*Cin)  im2col-over-rows lhs for conv1
        # ycat_ref : VMEM (Bn, H, 3*W*Cout) same for conv2 (never hits HBM)

        def build_cat(cat_ref, src, wc):
            # Section kh=1 (centre row): full copy.
            cat_ref[:, :, wc:2 * wc] = src
            # Section kh=0: output row h reads input row h-1 (zero at h=0).
            cat_ref[:, 1:, 0:wc] = src[:, :H - 1, :]
            cat_ref[:, 0:1, 0:wc] = jnp.zeros((Bn, 1, wc), cdt)
            # Section kh=2: output row h reads input row h+1 (zero at h=H-1).
            cat_ref[:, :H - 1, 2 * wc:] = src[:, 1:, :]
            cat_ref[:, H - 1:, 2 * wc:] = jnp.zeros((Bn, 1, wc), cdt)

        def conv(cat_ref, wf_ref, b_row, k):
            # Single matmul per conv: (Bn*H, k) x (k, W*Cout), f32 accumulate.
            lhs = cat_ref[...].reshape(Bn * H, k)
            acc = jnp.dot(lhs, wf_ref[...],
                          preferred_element_type=jnp.float32)
            return jnp.maximum(acc + b_row, 0.0)      # bias + ReLU in f32

        build_cat(xcat_ref, x_ref[...], wc_in)
        y1 = conv(xcat_ref, wf1_ref, b1_ref[...], 3 * wc_in)     # (Bn*H, 128)

        build_cat(ycat_ref, y1.reshape(Bn, H, wc_out).astype(cdt), wc_out)
        y2 = conv(ycat_ref, wf2_ref, b2_ref[...], 3 * wc_out)

        o_ref[...] = y2.reshape(Bn, H, wc_out).astype(o_ref.dtype)

    return kernel


def two_conv_relu(x, params, *, compute_dtype=jnp.bfloat16, layout="NCHW",
                  target_m=256):
    """TwoConvReLU.forward as a single fused pallas_call.

    compute_dtype: bf16 (default, MXU-native operands on v6e/v7x, f32 accum)
                   or f32 (bit-faithful to the PyTorch module; preferred on
                   v5e if the matmul is not the bottleneck).
    layout:        "NCHW" (PyTorch convention) or "NHWC" (skips the two
                   wrapper-side HBM relayouts entirely).
    NOTE(scaling): the fused banded weights are (3*W*Cin, W*Cout) / (3*W*Cout,
    W*Cout) and grow ~ W^2*C^2; for realistic conv sizes tile W (band per
    W-tile) or fall back to per-tap Cin-as-K matmuls, re-derive tiling for
    v7x's 64 MiB VMEM, and raise vmem_limit_bytes in CompilerParams.
    """
    if layout == "NCHW":
        x_nhwc = jnp.transpose(x, (0, 2, 3, 1))
    elif layout == "NHWC":
        x_nhwc = x
    else:
        raise ValueError(f"unknown layout {layout!r}")

    N, H, W, Cin = x_nhwc.shape
    Cout = params["w1"].shape[-1]
    cdt = compute_dtype

    bn = _choose_bn(N, H, target_m)
    n_pad = -(-N // bn) * bn

    # Row-flatten to (N, H, W*Cin); pad the batch to a multiple of bn.
    x_rows = x_nhwc.reshape(N, H, W * Cin).astype(cdt)
    if n_pad != N:
        x_rows = jnp.pad(x_rows, ((0, n_pad - N), (0, 0), (0, 0)))

    wf1 = _fused_band_weights(params["w1"], W, cdt)   # (3*W*Cin,  W*Cout)
    wf2 = _fused_band_weights(params["w2"], W, cdt)   # (3*W*Cout, W*Cout)
    b1 = jnp.tile(params["b1"].astype(jnp.float32), W).reshape(1, W * Cout)
    b2 = jnp.tile(params["b2"].astype(jnp.float32), W).reshape(1, W * Cout)

    kernel = _make_fused_kernel(bn, H, W, Cin, Cout, cdt)

    itemsize = jnp.dtype(cdt).itemsize
    cost = pl.CostEstimate(
        flops=2 * 9 * n_pad * H * W * (Cin * Cout + Cout * Cout),
        transcendentals=0,
        bytes_accessed=int(
            x_rows.size * itemsize + wf1.size * itemsize + wf2.size * itemsize
            + b1.size * 4 + b2.size * 4 + n_pad * H * W * Cout * 4),
    )

    out_rows = pl.pallas_call(
        kernel,
        out_shape=jax.ShapeDtypeStruct((n_pad, H, W * Cout), jnp.float32),
        grid=(n_pad // bn,),
        in_specs=[
            pl.BlockSpec((bn, H, W * Cin), lambda n: (n, 0, 0)),
            pl.BlockSpec((3 * W * Cin, W * Cout), lambda n: (0, 0)),
            pl.BlockSpec((1, W * Cout), lambda n: (0, 0)),
            pl.BlockSpec((3 * W * Cout, W * Cout), lambda n: (0, 0)),
            pl.BlockSpec((1, W * Cout), lambda n: (0, 0)),
        ],
        out_specs=pl.BlockSpec((bn, H, W * Cout), lambda n: (n, 0, 0)),
        scratch_shapes=[
            pltpu.VMEM((bn, H, 3 * W * Cin), cdt),
            pltpu.VMEM((bn, H, 3 * W * Cout), cdt),
        ],
        compiler_params=pltpu.CompilerParams(
            dimension_semantics=("parallel",)),
        cost_estimate=cost,
    )(x_rows, wf1, b1, wf2, b2)

    out_nhwc = out_rows.reshape(n_pad, H, W, Cout)[:N]
    if layout == "NCHW":
        return jnp.transpose(out_nhwc, (0, 3, 1, 2))
    return out_nhwc


def _reference(x_nchw, params):
    """Pure-JAX/XLA reference for verification."""
    def conv(x, w, b):
        y = lax.conv_general_dilated(
            x, jnp.transpose(w, (3, 2, 0, 1)),
            window_strides=(1, 1), padding=((1, 1), (1, 1)),
            dimension_numbers=("NCHW", "OIHW", "NCHW"))
        return jnp.maximum(y + b[None, :, None, None], 0.0)
    y = conv(x_nchw, params["w1"], params["b1"])
    return conv(y, params["w2"], params["b2"])


if __name__ == "__main__":
    N, Cin, Cout, H, W = 2, 4, 8, 16, 16

    key = jax.random.PRNGKey(0)
    kx, kw1, kb1, kw2, kb2, kx2 = jax.random.split(key, 6)

    x = jax.random.normal(kx, (N, Cin, H, W), jnp.float32)
    params = {
        "w1": 0.1 * jax.random.normal(kw1, (3, 3, Cin, Cout), jnp.float32),
        "b1": 0.1 * jax.random.normal(kb1, (Cout,), jnp.float32),
        "w2": 0.1 * jax.random.normal(kw2, (3, 3, Cout, Cout), jnp.float32),
        "b2": 0.1 * jax.random.normal(kb2, (Cout,), jnp.float32),
    }

    ref = jax.block_until_ready(_reference(x, params))

    # f32 path: faithful to the PyTorch module's numerics (tight check).
    out_f32 = jax.block_until_ready(
        two_conv_relu(x, params, compute_dtype=jnp.float32))
    assert out_f32.shape == (N, Cout, H, W), out_f32.shape
    assert jnp.allclose(out_f32, ref, atol=1e-4, rtol=1e-4), (
        float(jnp.max(jnp.abs(out_f32 - ref))))

    # bf16-operand default (MXU-native path on v6e/v7x; accumulation in f32).
    out_bf16 = jax.block_until_ready(two_conv_relu(x, params))
    assert jnp.allclose(out_bf16, ref, atol=1e-1, rtol=1e-1), (
        float(jnp.max(jnp.abs(out_bf16 - ref))))

    # Ragged batch: exercises Bn > 1 M-batching and the pad/slice path.
    N2 = 5
    x2 = jax.random.normal(kx2, (N2, Cin, H, W), jnp.float32)
    ref2 = jax.block_until_ready(_reference(x2, params))
    out2 = jax.block_until_ready(
        two_conv_relu(x2, params, compute_dtype=jnp.float32))
    assert out2.shape == (N2, Cout, H, W), out2.shape
    assert jnp.allclose(out2, ref2, atol=1e-4, rtol=1e-4), (
        float(jnp.max(jnp.abs(out2 - ref2))))

    print("KERNEL_OK")
</pallas_src>

<mosaic_0001>
module attributes {stable_mosaic.version = 11 : i64} {
  func.func @kernel(%arg0: i32, %arg1: memref<1x16x64xf32, #tpu.memory_space<vmem>>, %arg2: memref<192x128xf32, #tpu.memory_space<vmem>>, %arg3: memref<1x128xf32, #tpu.memory_space<vmem>>, %arg4: memref<384x128xf32, #tpu.memory_space<vmem>>, %arg5: memref<1x128xf32, #tpu.memory_space<vmem>>, %arg6: memref<1x16x128xf32, #tpu.memory_space<vmem>>, %arg7: memref<1x16x192xf32, #tpu.memory_space<vmem>>, %arg8: memref<1x16x384xf32, #tpu.memory_space<vmem>>) attributes {dimension_semantics = [#tpu.dimension_semantics<parallel>], iteration_bounds = array<i64: 2>, scalar_prefetch = 0 : i64, scratch_operands = 2 : i64, tpu.core_type = #tpu.core_type<tc>, window_params = [{transform_indices = @transform_0, window_bounds = array<i64: 1, 16, 64>}, {pipeline_mode = #tpu.pipeline_mode<synchronous>, transform_indices = @transform_1, window_bounds = array<i64: 192, 128>}, {pipeline_mode = #tpu.pipeline_mode<synchronous>, transform_indices = @transform_2, window_bounds = array<i64: 1, 128>}, {pipeline_mode = #tpu.pipeline_mode<synchronous>, transform_indices = @transform_3, window_bounds = array<i64: 384, 128>}, {pipeline_mode = #tpu.pipeline_mode<synchronous>, transform_indices = @transform_4, window_bounds = array<i64: 1, 128>}, {transform_indices = @transform_5, window_bounds = array<i64: 1, 16, 128>}]} {
    %c0 = arith.constant 0 : index
    %c0_0 = arith.constant 0 : index
    %c0_1 = arith.constant 0 : index
    %0 = vector.load %arg1[%c0, %c0_0, %c0_1] : memref<1x16x64xf32, #tpu.memory_space<vmem>>, vector<1x16x64xf32>
    %c0_2 = arith.constant 0 : index
    %c0_3 = arith.constant 0 : index
    %c64 = arith.constant 64 : index
    %1 = vector.load %arg7[%c0_2, %c0_3, %c64] : memref<1x16x192xf32, #tpu.memory_space<vmem>>, vector<1x16x64xf32>
    tpu.vector_store %arg7[%c0_2, %c0_3, %c64], %0 {strides = array<i32>} : memref<1x16x192xf32, #tpu.memory_space<vmem>>, vector<1x16x64xf32>,
    %2 = vector.extract_strided_slice %0 {offsets = [0, 0, 0], sizes = [1, 15, 64], strides = [1, 1, 1]} : vector<1x16x64xf32> to vector<1x15x64xf32>
    %c0_4 = arith.constant 0 : index
    %c1 = arith.constant 1 : index
    %c0_5 = arith.constant 0 : index
    %3 = vector.load %arg7[%c0_4, %c1, %c0_5] : memref<1x16x192xf32, #tpu.memory_space<vmem>>, vector<1x15x64xf32>
    tpu.vector_store %arg7[%c0_4, %c1, %c0_5], %2 {strides = array<i32>} : memref<1x16x192xf32, #tpu.memory_space<vmem>>, vector<1x15x64xf32>,
    %cst = arith.constant 0.000000e+00 : f32
    %4 = vector.broadcast %cst : f32 to vector<1x1x64xf32>
    %c0_6 = arith.constant 0 : index
    %c0_7 = arith.constant 0 : index
    %c0_8 = arith.constant 0 : index
    %5 = vector.load %arg7[%c0_6, %c0_7, %c0_8] : memref<1x16x192xf32, #tpu.memory_space<vmem>>, vector<1x1x64xf32>
    tpu.vector_store %arg7[%c0_6, %c0_7, %c0_8], %4 {strides = array<i32>} : memref<1x16x192xf32, #tpu.memory_space<vmem>>, vector<1x1x64xf32>,
    %6 = vector.extract_strided_slice %0 {offsets = [0, 1, 0], sizes = [1, 15, 64], strides = [1, 1, 1]} : vector<1x16x64xf32> to vector<1x15x64xf32>
    %c0_9 = arith.constant 0 : index
    %c0_10 = arith.constant 0 : index
    %c128 = arith.constant 128 : index
    %7 = vector.load %arg7[%c0_9, %c0_10, %c128] : memref<1x16x192xf32, #tpu.memory_space<vmem>>, vector<1x15x64xf32>
    tpu.vector_store %arg7[%c0_9, %c0_10, %c128], %6 {strides = array<i32>} : memref<1x16x192xf32, #tpu.memory_space<vmem>>, vector<1x15x64xf32>,
    %cst_11 = arith.constant 0.000000e+00 : f32
    %8 = vector.broadcast %cst_11 : f32 to vector<1x1x64xf32>
    %c0_12 = arith.constant 0 : index
    %c15 = arith.constant 15 : index
    %c128_13 = arith.constant 128 : index
    %9 = vector.load %arg7[%c0_12, %c15, %c128_13] : memref<1x16x192xf32, #tpu.memory_space<vmem>>, vector<1x1x64xf32>
    tpu.vector_store %arg7[%c0_12, %c15, %c128_13], %8 {strides = array<i32>} : memref<1x16x192xf32, #tpu.memory_space<vmem>>, vector<1x1x64xf32>,
    %c0_14 = arith.constant 0 : index
    %c0_15 = arith.constant 0 : index
    %10 = vector.load %arg3[%c0_14, %c0_15] : memref<1x128xf32, #tpu.memory_space<vmem>>, vector<1x128xf32>
    %c0_16 = arith.constant 0 : index
    %c0_17 = arith.constant 0 : index
    %c0_18 = arith.constant 0 : index
    %11 = vector.load %arg7[%c0_16, %c0_17, %c0_18] : memref<1x16x192xf32, #tpu.memory_space<vmem>>, vector<1x16x192xf32>
    %12 = vector.shape_cast %11 : vector<1x16x192xf32> to vector<16x192xf32>
    %c0_19 = arith.constant 0 : index
    %c0_20 = arith.constant 0 : index
    %13 = vector.load %arg2[%c0_19, %c0_20] : memref<192x128xf32, #tpu.memory_space<vmem>>, vector<192x128xf32>
    %cst_21 = arith.constant dense<0.000000e+00> : vector<16x128xf32>
    %14 = tpu.matmul %12, %13, %cst_21 {dimension_numbers = #tpu.dot_dimension_numbers<[1], [0], [0], [1], [0, 0, 1, 1], [], []>} : vector<16x192xf32>, vector<192x128xf32>, vector<16x128xf32> -> vector<16x128xf32>
    %15 = vector.broadcast %10 : vector<1x128xf32> to vector<16x128xf32>
    %16 = arith.addf %14, %15 : vector<16x128xf32>
    %cst_22 = arith.constant 0.000000e+00 : f32
    %17 = vector.broadcast %cst_22 : f32 to vector<16x128xf32>
    %18 = arith.maximumf %16, %17 : vector<16x128xf32>
    %19 = vector.shape_cast %18 : vector<16x128xf32> to vector<1x16x128xf32>
    %c0_23 = arith.constant 0 : index
    %c0_24 = arith.constant 0 : index
    %c128_25 = arith.constant 128 : index
    %20 = vector.load %arg8[%c0_23, %c0_24, %c128_25] : memref<1x16x384xf32, #tpu.memory_space<vmem>>, vector<1x16x128xf32>
    tpu.vector_store %arg8[%c0_23, %c0_24, %c128_25], %19 {strides = array<i32>} : memref<1x16x384xf32, #tpu.memory_space<vmem>>, vector<1x16x128xf32>,
    %21 = vector.extract_strided_slice %19 {offsets = [0, 0, 0], sizes = [1, 15, 128], strides = [1, 1, 1]} : vector<1x16x128xf32> to vector<1x15x128xf32>
    %c0_26 = arith.constant 0 : index
    %c1_27 = arith.constant 1 : index
    %c0_28 = arith.constant 0 : index
    %22 = vector.load %arg8[%c0_26, %c1_27, %c0_28] : memref<1x16x384xf32, #tpu.memory_space<vmem>>, vector<1x15x128xf32>
    tpu.vector_store %arg8[%c0_26, %c1_27, %c0_28], %21 {strides = array<i32>} : memref<1x16x384xf32, #tpu.memory_space<vmem>>, vector<1x15x128xf32>,
    %cst_29 = arith.constant 0.000000e+00 : f32
    %23 = vector.broadcast %cst_29 : f32 to vector<1x1x128xf32>
    %c0_30 = arith.constant 0 : index
    %c0_31 = arith.constant 0 : index
    %c0_32 = arith.constant 0 : index
    %24 = vector.load %arg8[%c0_30, %c0_31, %c0_32] : memref<1x16x384xf32, #tpu.memory_space<vmem>>, vector<1x1x128xf32>
    tpu.vector_store %arg8[%c0_30, %c0_31, %c0_32], %23 {strides = array<i32>} : memref<1x16x384xf32, #tpu.memory_space<vmem>>, vector<1x1x128xf32>,
    %25 = vector.extract_strided_slice %19 {offsets = [0, 1, 0], sizes = [1, 15, 128], strides = [1, 1, 1]} : vector<1x16x128xf32> to vector<1x15x128xf32>
    %c0_33 = arith.constant 0 : index
    %c0_34 = arith.constant 0 : index
    %c256 = arith.constant 256 : index
    %26 = vector.load %arg8[%c0_33, %c0_34, %c256] : memref<1x16x384xf32, #tpu.memory_space<vmem>>, vector<1x15x128xf32>
    tpu.vector_store %arg8[%c0_33, %c0_34, %c256], %25 {strides = array<i32>} : memref<1x16x384xf32, #tpu.memory_space<vmem>>, vector<1x15x128xf32>,
    %cst_35 = arith.constant 0.000000e+00 : f32
    %27 = vector.broadcast %cst_35 : f32 to vector<1x1x128xf32>
    %c0_36 = arith.constant 0 : index
    %c15_37 = arith.constant 15 : index
    %c256_38 = arith.constant 256 : index
    %28 = vector.load %arg8[%c0_36, %c15_37, %c256_38] : memref<1x16x384xf32, #tpu.memory_space<vmem>>, vector<1x1x128xf32>
    tpu.vector_store %arg8[%c0_36, %c15_37, %c256_38], %27 {strides = array<i32>} : memref<1x16x384xf32, #tpu.memory_space<vmem>>, vector<1x1x128xf32>,
    %c0_39 = arith.constant 0 : index
    %c0_40 = arith.constant 0 : index
    %29 = vector.load %arg5[%c0_39, %c0_40] : memref<1x128xf32, #tpu.memory_space<vmem>>, vector<1x128xf32>
    %c0_41 = arith.constant 0 : index
    %c0_42 = arith.constant 0 : index
    %c0_43 = arith.constant 0 : index
    %30 = vector.load %arg8[%c0_41, %c0_42, %c0_43] : memref<1x16x384xf32, #tpu.memory_space<vmem>>, vector<1x16x384xf32>
    %31 = vector.shape_cast %30 : vector<1x16x384xf32> to vector<16x384xf32>
    %c0_44 = arith.constant 0 : index
    %c0_45 = arith.constant 0 : index
    %32 = vector.load %arg4[%c0_44, %c0_45] : memref<384x128xf32, #tpu.memory_space<vmem>>, vector<384x128xf32>
    %cst_46 = arith.constant dense<0.000000e+00> : vector<16x128xf32>
    %33 = tpu.matmul %31, %32, %cst_46 {dimension_numbers = #tpu.dot_dimension_numbers<[1], [0], [0], [1], [0, 0, 1, 1], [], []>} : vector<16x384xf32>, vector<384x128xf32>, vector<16x128xf32> -> vector<16x128xf32>
    %34 = vector.broadcast %29 : vector<1x128xf32> to vector<16x128xf32>
    %35 = arith.addf %33, %34 : vector<16x128xf32>
    %cst_47 = arith.constant 0.000000e+00 : f32
    %36 = vector.broadcast %cst_47 : f32 to vector<16x128xf32>
    %37 = arith.maximumf %35, %36 : vector<16x128xf32>
    %38 = vector.shape_cast %37 : vector<16x128xf32> to vector<1x16x128xf32>
    %c0_48 = arith.constant 0 : index
    %c0_49 = arith.constant 0 : index
    %c0_50 = arith.constant 0 : index
    %39 = vector.load %arg6[%c0_48, %c0_49, %c0_50] : memref<1x16x128xf32, #tpu.memory_space<vmem>>, vector<1x16x128xf32>
    tpu.vector_store %arg6[%c0_48, %c0_49, %c0_50], %38 {strides = array<i32>} : memref<1x16x128xf32, #tpu.memory_space<vmem>>, vector<1x16x128xf32>,
    return
  }
  func.func @transform_0(%arg0: i32) -> (i32, i32, i32) {
    %c0_i32 = arith.constant 0 : i32
    %c0_i32_0 = arith.constant 0 : i32
    %c0_i32_1 = arith.constant 0 : i32
    return %arg0, %c0_i32, %c0_i32_0 : i32, i32, i32
  }
  func.func @transform_1(%arg0: i32) -> (i32, i32) {
    %c0_i32 = arith.constant 0 : i32
    %c0_i32_0 = arith.constant 0 : i32
    %c0_i32_1 = arith.constant 0 : i32
    return %c0_i32, %c0_i32_0 : i32, i32
  }
  func.func @transform_2(%arg0: i32) -> (i32, i32) {
    %c0_i32 = arith.constant 0 : i32
    %c0_i32_0 = arith.constant 0 : i32
    %c0_i32_1 = arith.constant 0 : i32
    return %c0_i32, %c0_i32_0 : i32, i32
  }
  func.func @transform_3(%arg0: i32) -> (i32, i32) {
    %c0_i32 = arith.constant 0 : i32
    %c0_i32_0 = arith.constant 0 : i32
    %c0_i32_1 = arith.constant 0 : i32
    return %c0_i32, %c0_i32_0 : i32, i32
  }
  func.func @transform_4(%arg0: i32) -> (i32, i32) {
    %c0_i32 = arith.constant 0 : i32
    %c0_i32_0 = arith.constant 0 : i32
    %c0_i32_1 = arith.constant 0 : i32
    return %c0_i32, %c0_i32_0 : i32, i32
  }
  func.func @transform_5(%arg0: i32) -> (i32, i32, i32) {
    %c0_i32 = arith.constant 0 : i32
    %c0_i32_0 = arith.constant 0 : i32
    %c0_i32_1 = arith.constant 0 : i32
    return %arg0, %c0_i32, %c0_i32_0 : i32, i32, i32
  }
}

</mosaic_0001>

<bundles_post_ra>
// kernel: tpu_custom_call.1
= control target key start
LH: loop header
LB: loop body
LE: loop exit
PB: predicated region body
PF: predicated region fallthrough
CT: control target
= control target key end

     0   :  { %10 = vsyncpa [#allocation5], 0  ;;  %s1545_s0 = inlined_call_operand.hbm [shape: f32[2,16,64], index: 0, kind: input, shape index: {}]   ;;  %s1546_s1 = inlined_call_operand.hbm [shape: f32[192,128], index: 1, kind: input, shape index: {}]   ;;  %s1547_s2 = inlined_call_operand.vmem [shape: f32[1,128], index: 2, kind: input, shape index: {}]   ;;  %s1548_s3 = inlined_call_operand.hbm [shape: f32[384,128], index: 3, kind: input, shape index: {}]   ;;  %s1549_s4 = inlined_call_operand.vmem [shape: f32[1,128], index: 4, kind: input, shape index: {}]   ;;  %s1550_s5 = inlined_call_operand.hbm [shape: f32[2,16,128], index: 5, kind: output, shape index: {}]  }
   0x1   :  { %12 = vsyncpa [#allocation5 + $0x1], 0 }
   0x2   :  { %13 = vsyncpa [#allocation8], 0 }
   0x3   :  { %14 = vsyncpa [#allocation6], 0 }
   0x4   :  { %16 = vsyncpa [#allocation6 + $0x1], 0  ;;  %s1254_s18 = smov 0   ;;  %s1256_s19 = smov 0  }
   0x5   :  { %s1258_s20 = smov 0   ;;  %s1260_s21 = smov 0  }
   0x6 LB: > { %s1275_s22 = sadd.s32 4294967295, %s1211_s21   ;;  %s766_s23 = sadd.s32 4294967294, %s1211_s21   ;;  %s1211_s21 = sphi %s1260_s21, %s1570_s21   ;;  %s1207_s20 = sphi %s1258_s20, %s1569_s20   ;;  %s1203_s19 = sphi %s1256_s19, %s1568_s19   ;;  %s1199_s18 = sphi %s1254_s18, %s1567_s18  }
   0x7   : > { %p42_p0 = scmp.ne.s32.totalorder %s1203_s19, %s1199_s18  ;;  %p1551_p1 = scmp.eq.s32.totalorder %s1275_s22, 0 }
   0x8   : > { %p156_p3 = scmp.eq.s32.totalorder %s766_s23, 1  ;;  %p767_p5 = scmp.ge.s32.totalorder %s1211_s21, 1 }
   0x9   : > { %p1284_p4 = por %p1551_p1, %p42_p0  ;;  %p163_p7 = scmp.lt.s32.totalorder %s1211_s21, 3 }
   0xa   : > { %p1289_p6 = por %p156_p3, %p42_p0  ;;  %s1213_s27 = smov [#allocation7]  }
   0xb   : > { %s1554_s24 = scalar_select %p1284_p4, 1, 0 }
   0xc   : > { %s1555_s25 = scalar_select %p1289_p6, 1, 0 }
   0xd   : > { %p1294_p8 = pnand %p767_p5, %p163_p7  ;;  %s175_s28 = sshll.u32 %s1213_s27, 4  ;;  %s1298_s28 = int_to_ptr.vmem [resolvable:$true] %s175_s28 }
   0xe   : > { %s1214_s30 = smov [#allocation9]   ;;  %s1055_s9 = scalar_lea.hbm %s1546_s1, 3072 }
   0xf   : > { %p993_p9 = pneg %p1294_p8  ;;  %s191_s6 = sshll.u32 %s1214_s30, 4  ;;  %s1309_s6 = int_to_ptr.vmem [resolvable:$true] %s191_s6 }
  0x10   : > { %p1056_p12 = scmp.ne.s32.totalorder %s1546_s1, %s1055_s9  ;;  %p1062_p5 = scmp.lt.u32.totalorder %s1055_s9, %s1546_s1 }
  0x11   : > { %p1305_p11 = pnand %p993_p9, %p1551_p1 }
  0x13   : > { %p1057_p13 = pneg %p1305_p11 }
  0x15   : > { %p1058_p0 = pnand %p1057_p13, %p1056_p12 }
  0x17   : > { %p1059_p3 = pneg %p1058_p0 }
  0x19   : > { %p1064_p7 = pnand %p1062_p5, %p1059_p3 }
  0x1b   : > { %1067 = shalt.err (!%p1064_p7)
}
  0x1c   : > { %s1068_s14 = scalar_lea.vmem %s1298_s28, 3072  ;;  %p1076_p2 = scmp.lt.s32.totalorder %s1298_s28, %s1298_s28 }
  0x1d   : > { %p1069_p9 = scmp.ne.s32.totalorder %s1298_s28, %s1068_s14  ;;  %p1077_p12 = scmp.lt.s32.totalorder %s1068_s14, %s1068_s14 }
  0x1f   : > { %p1071_p10 = pnand %p1069_p9, %p1057_p13  ;;  %p1078_p0 = por %p1077_p12, %p1076_p2 }
  0x21   : > { %p1072_p1 = pneg %p1071_p10 }
  0x23   : > { %p1079_p6 = pnand %p1078_p0, %p1072_p1 }
  0x25   : > { %1082 = shalt.err (!%p1079_p6)
}
  0x26   : > { %s1215_s15 = smov 128   ;;  %s1216_s16 = smov 8  }
  0x27   : > { %996 = dma.hbm_to_vmem [thread:$0]  (!%p1305_p11), %s1546_s1, 3072, %s1298_s28, [#allocation8], %s1215_s15, %s1215_s15, %s1216_s16  }
  0x28   : > { %s1083_s7 = scalar_lea.hbm %s1548_s3, 6144 }
  0x29   : > { %p1084_p1 = scmp.ne.s32.totalorder %s1548_s3, %s1083_s7  ;;  %p1090_p10 = scmp.lt.u32.totalorder %s1083_s7, %s1548_s3 }
  0x2b   : > { %p1086_p2 = pnand %p1084_p1, %p1057_p13 }
  0x2d   : > { %p1087_p6 = pneg %p1086_p2 }
  0x2f   : > { %p1092_p3 = pnand %p1090_p10, %p1087_p6 }
  0x31   : > { %1095 = shalt.err (!%p1092_p3)
}
  0x32   : > { %s1096_s28 = scalar_lea.vmem %s1309_s6, 6144  ;;  %p1104_p12 = scmp.lt.s32.totalorder %s1309_s6, %s1309_s6 }
  0x33   : > { %p1097_p5 = scmp.ne.s32.totalorder %s1309_s6, %s1096_s28  ;;  %p1105_p0 = scmp.lt.s32.totalorder %s1096_s28, %s1096_s28 }
  0x35   : > { %p1099_p7 = pnand %p1097_p5, %p1057_p13  ;;  %p1106_p1 = por %p1105_p0, %p1104_p12 }
  0x37   : > { %p1100_p9 = pneg %p1099_p7 }
  0x39   : > { %p1107_p2 = pnand %p1106_p1, %p1100_p9 }
  0x3b   : > { %1110 = shalt.err (!%p1107_p2)
}
  0x3c   : > { %999 = dma.hbm_to_vmem [thread:$0]  (!%p1305_p11), %s1548_s3, 6144, %s1309_s6, [#allocation8], %s1215_s15, %s1215_s15, %s1216_s16  }
  0x3d   : > { %s1370_s29 = sadd.s32 1, %s1211_s21   ;;  %s29_s14 = sadd.s32 1, %s1207_s20 }
  0x3e   : > { %s26_s17 = ssub.s32 %s1211_s21, %s1370_s29  ;;  %p36_p13 = scmp.ne.s32.totalorder %s1207_s20, %s1203_s19 }
  0x3f   : > { %p27_p6 = scmp.eq.s32.totalorder %s26_s17, 0  ;;  %p37_p10 = scmp.eq.s32.totalorder %s1211_s21, 0 }
  0x40   : > { %p1558_p3 = scmp.eq.s32.totalorder %s1275_s22, 1  ;;  %p1010_p7 = scmp.lt.s32.totalorder %s1211_s21, 2 }
  0x41   : > { %s1386_s27 = scalar_select %p27_p6, %s1207_s20, %s29_s14  }
  0x42   : > { %p1380_p5 = por %p1558_p3, %p36_p13  ;;  %p38_p9 = por %p37_p10, %p36_p13 }
  0x43   : > { %s208_s30 = sand.u32 1, %s1207_s20   ;;  %s788_s6 = sshll.u32 %s1211_s21, 8 }
  0x44   : > { %s1559_s23 = scalar_select %p1380_p5, 1, 0 }
  0x45   : > { %s771_s7 = sshll.u32 %s208_s30, 4  ;;  %s1393_s10 = scalar_lea.hbm %s1545_s0, %s788_s6 }
  0x46   : > { %s212_s11 = scalar_lea.vmem [#allocation4], %s771_s7  ;;  %p1397_p11 = pnand %p1010_p7, %p38_p9 }
  0x47   : > { %s219_s28 = sshll.u32 %s212_s11, 4  ;;  %s1401_s13 = scalar_lea.sflag [#allocation5], %s208_s30  ;;  %s1395_s28 = int_to_ptr.vmem [resolvable:$true] %s219_s28 }
  0x48   : > { %s1111_s14 = scalar_lea.hbm %s1393_s10, 256  ;;  %p1113_p0 = pneg %p1397_p11 }
  0x49   : > { %p1112_p12 = scmp.ne.s32.totalorder %s1393_s10, %s1111_s14  ;;  %s1116_s6 = scalar_lea.hbm %s1545_s0, 512 }
  0x4a   : > { %p1117_p13 = scmp.lt.u32.totalorder %s1393_s10, %s1545_s0  ;;  %p1118_p6 = scmp.lt.u32.totalorder %s1116_s6, %s1111_s14 }
  0x4b   : > { %p1114_p1 = pnand %p1113_p0, %p1112_p12  ;;  %p1120_p3 = scmp.lt.u32.totalorder %s1111_s14, %s1393_s10 }
  0x4c   : > { %p1119_p10 = por %p1118_p6, %p1117_p13 }
  0x4d   : > { %p1115_p2 = pneg %p1114_p1 }
  0x4e   : > { %p1121_p7 = por %p1120_p3, %p1119_p10 }
  0x50   : > { %p1122_p9 = pnand %p1121_p7, %p1115_p2 }
  0x52   : > { %1125 = shalt.err (!%p1122_p9)
}
  0x53   : > { %s1126_s30 = scalar_lea.vmem %s1395_s28, 256  ;;  %s1217_s11 = smov [#allocation4]  }
  0x54   : > { %p1127_p12 = scmp.ne.s32.totalorder %s1395_s28, %s1126_s30  ;;  %s1131_s17 = sshll.u32 %s1217_s11, 4  ;;  %s1132_s17 = int_to_ptr.vmem [resolvable:$false] %s1131_s17 }
  0x55   : > { %s1133_s7 = scalar_lea.vmem %s1132_s17, 512  ;;  %p1134_p4 = scmp.lt.s32.totalorder %s1395_s28, %s1132_s17 }
  0x56   : > { %p1129_p1 = pnand %p1127_p12, %p1113_p0  ;;  %p1135_p13 = scmp.lt.s32.totalorder %s1133_s7, %s1126_s30 }
  0x58   : > { %p1130_p5 = pneg %p1129_p1  ;;  %p1136_p6 = por %p1135_p13, %p1134_p4 }
  0x5a   : > { %p1137_p10 = pnand %p1136_p6, %p1130_p5 }
  0x5c   : > { %1140 = shalt.err (!%p1137_p10)
}
  0x5d   : > { %1003 = dma.hbm_to_vmem [thread:$0]  (!%p1397_p11), %s1393_s10, 256, %s1395_s28, %s1401_s13, %s1215_s15, %s1215_s15, %s1216_s16  }
  0x5e   : > { %231 = sbr.rel (%p1294_p8) target bundleno = 724 (0x2d4), region = 40  ;;  %s1435_s14 = sand.u32 (!%p1294_p8), 1, %s1203_s19  }
  0x5f   : > { %s775_s6 = sshll.u32 (!%p1294_p8), %s1435_s14, 4  ;;  %s234_s8 = scalar_lea.sflag (!%p1294_p8), [#allocation5], %s1435_s14 }
  0x60   : > { %s237_s12 = scalar_lea.vmem (!%p1294_p8), [#allocation4], %s775_s6  ;;  %p1561_p4 = scmp.ne.s32.totalorder (!%p1294_p8), %s1554_s24, 0 }
  0x65   : > { %1186 = dma.done.wait (%p1561_p4), %s234_s8, 256  }
  0x66   : > { %1188 = vsyncadd (%p1561_p4), %s234_s8, 4294967040  ;;  %p1562_p5 = scmp.eq.s32.totalorder %s1275_s22, 0 }
  0x68   : > { %1190 = dma.done.wait (%p1562_p5), [#allocation8], 9216   ;;  %p1563_p8 = pmov %p1562_p5 }
  0x69   : > { %v1218_v0 = vmov 0.0|0.0   ;;  %vm295_vm0 = vcmask 516096   ;;  %v1219_v1 = vmov 0.0   ;;  %vm285_vm1 = vcmask 1040384   ;;  %v1454_v2 = vld [vmem:[%s237_s12] sm:$0xff]  ;;  %v273_v3 = vld [vmem:[%s237_s12 + $0x8] sm:$0xff] }
  0x6a   : > { %1192 = vsyncadd (%p1563_p8), [#allocation8], 4294958080  ;;  %881 = vmatprep.subr.bf16.mxu0 %v1218_v0  ;;  %306 = vst.msk [vmem:[#allocation2 + $0x1f] sm:$0x1] %vm295_vm0, %v1219_v1  ;;  %vm297_vm2 = vcmask 1046528   ;;  %vm304_vm3 = vcmask 522240  }
  0x6b   : > { %436 = vst [vmem:[#allocation3] sm:$0x1] %v1219_v1  ;;  %444 = vst [vmem:[#allocation3 + $0x2f] sm:$0x1] %v1219_v1  ;;  %v312_v4 = vld [vmem:[#allocation7] sm:$0xff]  ;;  %vm293_vm4 = vcmask 523264  }
  0x6c   : > { %s1220_s24 = smov 64   ;;  %v286_v5 = vrot.slane %v1454_v2, 7  ;;  %v298_v6 = vrot.slane %v1454_v2, 1  ;;  %v287_v7 = vrot.slane %v273_v3, 7  ;;  %v299_v8 = vrot.slane %v273_v3, 1  ;;  %v313_v9 = vld [vmem:[#allocation7 + $0x8] sm:$0xff] }
  0x6d   : > { %276 = vrot.lane.b32.xlu0 %v1454_v2, %s1220_s24  ;;  %v314_v10 = vld [vmem:[#allocation7 + $0x10] sm:$0xff]  ;;  %v882_v11 = vpack.c.bf16 %v313_v9, %v312_v4  ;;  %v315_v12 = vld [vmem:[#allocation7 + $0x18] sm:$0xff]  ;;  %v316_v16 = vld [vmem:[#allocation7 + $0x20] sm:$0xff]  ;;  %vm282_vm5 = vcmask 1048064   ;;  %vm291_vm6 = vcmask 523265   ;;  %s271_s28 = scalar_lea.vmem [#allocation10], %s775_s6 }
  0x6e   : > { %305 = vst.msk [vmem:[#allocation2 + $0x18] sm:$0x7f] %vm304_vm3, %v299_v8  ;;  %v1462_v13 = vsel %vm285_vm1, %v286_v5, %v287_v7  ;;  %v300_v14 = vsel %vm297_vm2, %v298_v6, %v299_v8  ;;  %v885_v15 = vpack.c.bf16 %v315_v12, %v314_v10  ;;  %v317_v17 = vld [vmem:[#allocation7 + $0x28] sm:$0xff]  ;;  %v318_v19 = vld [vmem:[#allocation7 + $0x30] sm:$0xff]  ;;  %v319_v20 = vld [vmem:[#allocation7 + $0x38] sm:$0xff]  ;;  %s674_s13 = sshll.u32 %s271_s28, 4  ;;  %s1496_s13 = int_to_ptr.vmem [resolvable:$true] %s674_s13 }
  0x6f   : > { %883 = vmatpush1.bf16.msra.mxu0 %v882_v11  ;;  %303 = vst.msk [vmem:[#allocation2 + $0x8] sm:$0xff] %vm293_vm4, %v300_v14  ;;  %v888_v18 = vpack.c.bf16 %v317_v17, %v316_v16  ;;  %v468_v21 = vld [vmem:[#allocation9 + $0x80] sm:$0xff]  ;;  %v469_v22 = vld [vmem:[#allocation9 + $0x88] sm:$0xff]  ;;  %v470_v26 = vld [vmem:[#allocation9 + $0x90] sm:$0xff]  ;;  %v891_v31 = vpack.c.bf16 %v319_v20, %v318_v19  ;;  %s789_s9 = sshll.u32 %s1275_s22, 8  ;;  %s661_s7 = scalar_lea.sflag [#allocation6], %s1435_s14 }
  0x70   : > { %884 = vmatprep.subr.bf16.mxu0 %v1218_v0  ;;  %v452_v23 = vld [vmem:[#allocation9] sm:$0xff]  ;;  %v917_v24 = vpack.c.bf16 %v469_v22, %v468_v21  ;;  %v453_v25 = vld [vmem:[#allocation9 + $0x8] sm:$0xff]  ;;  %v471_v29 = vld [vmem:[#allocation9 + $0x98] sm:$0xff]  ;;  %s1501_s17 = scalar_lea.hbm %s1550_s5, %s789_s9  ;;  %s1141_s6 = scalar_lea.vmem %s1496_s13, 256 }
  0x71   : > { %278 = vrot.lane.b32.xlu0 %v273_v3, %s1220_s24  ;;  %v919_v28 = vpack.c.bf16 %v453_v25, %v452_v23  ;;  %v454_v30 = vld [vmem:[#allocation9 + $0x10] sm:$0xff]  ;;  %v921_v32 = vpack.c.bf16 %v471_v29, %v470_v26  ;;  %v455_v33 = vld [vmem:[#allocation9 + $0x18] sm:$0xff]  ;;  %v472_v34 = vld [vmem:[#allocation9 + $0xa0] sm:$0xff]  ;;  %p1142_p11 = scmp.ne.s32.totalorder %s1496_s13, %s1141_s6  ;;  %p1564_p0 = scmp.ne.s32.totalorder %s1559_s23, 0 }
  0x72   : > { %v473_v35 = vld [vmem:[#allocation9 + $0xa8] sm:$0xff]  ;;  %v320_v36 = vld [vmem:[#allocation7 + $0x40] sm:$0xff]  ;;  %918 = vmatprep.subr.bf16.mxu1 %v917_v24  ;;  %v923_v38 = vpack.c.bf16 %v455_v33, %v454_v30  ;;  %v474_v43 = vld [vmem:[#allocation9 + $0xb0] sm:$0xff]  ;;  %s1221_s22 = smov [#allocation10]  }
  0x73   : > { %886 = vmatpush1.bf16.msra.mxu0 %v885_v15  ;;  %v321_v37 = vld [vmem:[#allocation7 + $0x48] sm:$0xff]  ;;  %920 = vmatpush3.bf16.msra.mxu1 %v919_v28  ;;  %v925_v39 = vpack.c.bf16 %v473_v35, %v472_v34  ;;  %v456_v40 = vld [vmem:[#allocation9 + $0x20] sm:$0xff]  ;;  %v475_v44 = vld [vmem:[#allocation9 + $0xb8] sm:$0xff]  ;;  %p1143_p2 = pnand %p1142_p11, %p1564_p0  ;;  %s1145_s8 = sshll.u32 %s1221_s22, 4  ;;  %s1146_s8 = int_to_ptr.vmem [resolvable:$false] %s1145_s8 }
  0x74   : > { %887 = vmatprep.subr.bf16.mxu0 %v1218_v0  ;;  %922 = vmatprep.subr.bf16.mxu1 %v921_v32  ;;  %v457_v41 = vld [vmem:[#allocation9 + $0x28] sm:$0xff]  ;;  %v894_v42 = vpack.c.bf16 %v321_v37, %v320_v36  ;;  %v322_v45 = vld [vmem:[#allocation7 + $0x50] sm:$0xff]  ;;  %v323_v46 = vld [vmem:[#allocation7 + $0x58] sm:$0xff]  ;;  %v929_v48 = vpack.c.bf16 %v475_v44, %v474_v43  ;;  %s1147_s12 = scalar_lea.vmem %s1146_s8, 512  ;;  %p1148_p7 = scmp.lt.s32.totalorder %s1496_s13, %s1146_s8 }
  0x75   : > { %v927_v47 = vpack.c.bf16 %v457_v41, %v456_v40  ;;  %v458_v49 = vld [vmem:[#allocation9 + $0x30] sm:$0xff]  ;;  %v459_v50 = vld [vmem:[#allocation9 + $0x38] sm:$0xff]  ;;  %v897_v51 = vpack.c.bf16 %v323_v46, %v322_v45  ;;  %v476_v52 = vld [vmem:[#allocation9 + $0xc0] sm:$0xff]  ;;  %p1144_p3 = pneg %p1143_p2  ;;  %p1149_p9 = scmp.lt.s32.totalorder %s1147_s12, %s1141_s6 }
  0x76   : > { %v309_v27 = vld [vmem:[#allocation2 + $0x8] sm:$0xff]  ;;  %v477_v53 = vld [vmem:[#allocation9 + $0xc8] sm:$0xff]  ;;  %v324_v54 = vld [vmem:[#allocation7 + $0x60] sm:$0xff]  ;;  %v931_v56 = vpack.c.bf16 %v459_v50, %v458_v49 }
  0x77   : > { %889 = vmatpush1.bf16.msra.mxu0 %v888_v18  ;;  %780 = vmatprep.mubr.msk.f32.mxu0 %vm293_vm4, %v309_v27  ;;  %v325_v55 = vld [vmem:[#allocation7 + $0x68] sm:$0xff]  ;;  %v933_v57 = vpack.c.bf16 %v477_v53, %v476_v52  ;;  %v460_v58 = vld [vmem:[#allocation9 + $0x40] sm:$0xff]  ;;  %v326_v61 = vld [vmem:[#allocation7 + $0x70] sm:$0xff]  ;;  %p1150_p12 = por %p1149_p9, %p1148_p7 }
  0x78   : > { %890 = vmatprep.subr.bf16.mxu0 %v1218_v0  ;;  %924 = vmatpush3.bf16.msra.mxu1 %v923_v38  ;;  %v461_v59 = vld [vmem:[#allocation9 + $0x48] sm:$0xff]  ;;  %v900_v60 = vpack.c.bf16 %v325_v55, %v324_v54  ;;  %v327_v62 = vld [vmem:[#allocation7 + $0x78] sm:$0xff]  ;;  %v328_v4 = vld [vmem:[#allocation7 + $0x80] sm:$0xff] }
  0x79   : > { %926 = vmatprep.subr.bf16.mxu1 %v925_v39  ;;  %v935_v63 = vpack.c.bf16 %v461_v59, %v460_v58  ;;  %v903_v3 = vpack.c.bf16 %v327_v62, %v326_v61  ;;  %v329_v6 = vld [vmem:[#allocation7 + $0x88] sm:$0xff]  ;;  %v330_v8 = vld [vmem:[#allocation7 + $0x90] sm:$0xff]  ;;  %v331_v9 = vld [vmem:[#allocation7 + $0x98] sm:$0xff]  ;;  %p1151_p1 = pnand %p1150_p12, %p1144_p3 }
  0x7a   : > { %v906_v7 = vpack.c.bf16 %v329_v6, %v328_v4  ;;  %v909_v10 = vpack.c.bf16 %v331_v9, %v330_v8  ;;  %v332_v11 = vld [vmem:[#allocation7 + $0xa0] sm:$0xff]  ;;  %v333_v12 = vld [vmem:[#allocation7 + $0xa8] sm:$0xff]  ;;  %v334_v15 = vld [vmem:[#allocation7 + $0xb0] sm:$0xff] }
  0x7b   : > { %892 = vmatpush1.bf16.msra.mxu0 %v891_v31  ;;  %v912_v14 = vpack.c.bf16 %v333_v12, %v332_v11  ;;  %v335_v16 = vld [vmem:[#allocation7 + $0xb8] sm:$0xff]  ;;  %v311_v20 = vld [vmem:[#allocation2 + $0x18] sm:$0xff]  ;;  %v478_v22 = vld [vmem:[#allocation9 + $0xd0] sm:$0xff] }
  0x7c   : > { %893 = vmatprep.subr.bf16.mxu0 %v1218_v0  ;;  %928 = vmatpush3.bf16.msra.mxu1 %v927_v47  ;;  %v915_v17 = vpack.c.bf16 %v335_v16, %v334_v15  ;;  %v479_v23 = vld [vmem:[#allocation9 + $0xd8] sm:$0xff]  ;;  %v462_v2 = vld [vmem:[#allocation9 + $0x50] sm:$0xff]  ;;  %v481_v26 = vld [vmem:[#allocation9 + $0xe8] sm:$0xff] }
  0x7d   : > { %930 = vmatprep.subr.bf16.mxu1 %v929_v48  ;;  %v937_v24 = vpack.c.bf16 %v479_v23, %v478_v22  ;;  %v464_v28 = vld [vmem:[#allocation9 + $0x60] sm:$0xff]  ;;  %v482_v30 = vld [vmem:[#allocation9 + $0xf0] sm:$0xff]  ;;  %v483_v31 = vld [vmem:[#allocation9 + $0xf8] sm:$0xff] }
  0x7e   : > { %v945_v32 = vpack.c.bf16 %v483_v31, %v482_v30  ;;  %v466_v33 = vld [vmem:[#allocation9 + $0x70] sm:$0xff]  ;;  %v467_v34 = vld [vmem:[#allocation9 + $0x78] sm:$0xff]  ;;  %v484_v36 = vld [vmem:[#allocation9 + $0x100] sm:$0xff] }
  0x7f   : > { %895 = vmatpush1.bf16.msra.mxu0 %v894_v42  ;;  %v947_v35 = vpack.c.bf16 %v467_v34, %v466_v33  ;;  %v485_v37 = vld [vmem:[#allocation9 + $0x108] sm:$0xff]  ;;  %v779_v39 = vld [vmem:[%s1547_s2] ss:$0 sm:$0xff]  ;;  %v487_v53 = vld [vmem:[#allocation9 + $0x118] sm:$0xff] }
  0x80   : > { %896 = vmatprep.subr.bf16.mxu0 %v1218_v0  ;;  %932 = vmatpush3.bf16.msra.mxu1 %v931_v56  ;;  %v949_v38 = vpack.c.bf16 %v485_v37, %v484_v36  ;;  %v486_v52 = vld [vmem:[#allocation9 + $0x110] sm:$0xff]  ;;  %v488_v58 = vld [vmem:[#allocation9 + $0x120] sm:$0xff]  ;;  %v489_v59 = vld [vmem:[#allocation9 + $0x128] sm:$0xff] }
  0x81   : > { %934 = vmatprep.subr.bf16.mxu1 %v933_v57  ;;  %v953_v56 = vpack.c.bf16 %v487_v53, %v486_v52  ;;  %v490_v61 = vld [vmem:[#allocation9 + $0x130] sm:$0xff]  ;;  %v491_v62 = vld [vmem:[#allocation9 + $0x138] sm:$0xff]  ;;  %v493_v4 = vld [vmem:[#allocation9 + $0x148] sm:$0xff] }
  0x82   : > { %v495_v8 = vld [vmem:[#allocation9 + $0x158] sm:$0xff]  ;;  %v497_v11 = vld [vmem:[#allocation9 + $0x168] sm:$0xff]  ;;  %v782_v23 = vld [vmem:[%s1549_s4] ss:$0 sm:$0xff] }
  0x83   : > { %898 = vmatpush1.bf16.msra.mxu0 %v897_v51  ;;  %v499_v15 = vld [vmem:[#allocation9 + $0x178] sm:$0xff] }
  0x84   : > { %899 = vmatprep.subr.bf16.mxu0 %v1218_v0  ;;  %936 = vmatpush3.bf16.msra.mxu1 %v935_v63  ;;  %v961_v63 = vpack.c.bf16 %v491_v62, %v490_v61 }
  0x85   : > { %938 = vmatprep.subr.bf16.mxu1 %v937_v24 }
  0x87   : > { %901 = vmatpush1.bf16.msra.mxu0 %v900_v60  ;;  %v957_v60 = vpack.c.bf16 %v489_v59, %v488_v58 }
  0x88   : > { %902 = vmatprep.subr.bf16.mxu0 %v1218_v0 }
  0x8b   : > { %904 = vmatpush1.bf16.msra.mxu0 %v903_v3  ;;  %v492_v3 = vld [vmem:[#allocation9 + $0x140] sm:$0xff] }
  0x8c   : > { %905 = vmatprep.subr.bf16.mxu0 %v1218_v0  ;;  %v965_v6 = vpack.c.bf16 %v493_v4, %v492_v3 }
  0x8f   : > { %907 = vmatpush1.bf16.msra.mxu0 %v906_v7  ;;  %v494_v7 = vld [vmem:[#allocation9 + $0x150] sm:$0xff] }
  0x90   : > { %908 = vmatprep.subr.bf16.mxu0 %v1218_v0  ;;  %v969_v9 = vpack.c.bf16 %v495_v8, %v494_v7 }
  0x93   : > { %910 = vmatpush1.bf16.msra.mxu0 %v909_v10  ;;  %v496_v10 = vld [vmem:[#allocation9 + $0x160] sm:$0xff] }
  0x94   : > { %911 = vmatprep.subr.bf16.mxu0 %v1218_v0  ;;  %v973_v12 = vpack.c.bf16 %v497_v11, %v496_v10 }
  0x97   : > { %913 = vmatpush1.bf16.msra.mxu0 %v912_v14  ;;  %v498_v14 = vld [vmem:[#allocation9 + $0x170] sm:$0xff] }
  0x98   : > { %914 = vmatprep.subr.bf16.mxu0 %v1218_v0  ;;  %v977_v16 = vpack.c.bf16 %v499_v15, %v498_v14 }
  0x9b   : > { %916 = vmatpush1.bf16.msra.mxu0 %v915_v17 }
  0xdf   : > { %v277_v18 = vpop.permute.xlu0 %276 }
  0xe0   : > { %283 = vst.msk [vmem:[#allocation2] sm:$0xff] %vm282_vm5, %v277_v18 }
  0xe1   : > { %292 = vst.msk [vmem:[#allocation2] sm:$0xfe] %vm291_vm6, %v286_v5  ;;  %v463_v5 = vld [vmem:[#allocation9 + $0x58] sm:$0xff] }
  0xe2   : > { %296 = vst.msk [vmem:[#allocation2] sm:$0x1] %vm295_vm0, %v1219_v1  ;;  %v939_v25 = vpack.c.bf16 %v463_v5, %v462_v2  ;;  %v480_v1 = vld [vmem:[#allocation9 + $0xe0] sm:$0xff] }
  0xe3   : > { %v279_v19 = vpop.permute.xlu0 %278  ;;  %v941_v27 = vpack.c.bf16 %v481_v26, %v480_v1 }
  0xe4   : > { %284 = vst.msk [vmem:[#allocation2 + $0x10] sm:$0xff] %vm282_vm5, %v279_v19  ;;  %940 = vmatpush3.bf16.msra.mxu1 %v939_v25 }
  0xe5   : > { %294 = vst.msk [vmem:[#allocation2 + $0x10] sm:$0xff] %vm293_vm4, %v1462_v13  ;;  %v465_v13 = vld [vmem:[#allocation9 + $0x68] sm:$0xff]  ;;  %942 = vmatprep.subr.bf16.mxu1 %v941_v27 }
  0xe6   : > { %v943_v29 = vpack.c.bf16 %v465_v13, %v464_v28 }
  0xe8   : > { %944 = vmatpush3.bf16.msra.mxu1 %v943_v29 }
  0xe9   : > { %v308_v21 = vld [vmem:[#allocation2] sm:$0xff]  ;;  %946 = vmatprep.subr.bf16.mxu1 %v945_v32 }
  0xea   : > { %413 = vmatmul.mubr.f32.vlgmr.msra.gmra.mrb[0].mxu0 %v308_v21 }
  0xeb   : > { %781 = vmatprep.mubr.msk.f32.mxu0 %vm293_vm4, %v311_v20 }
  0xec   : > { %v310_v0 = vld [vmem:[#allocation2 + $0x10] sm:$0xff]  ;;  %948 = vmatpush3.bf16.msra.mxu1 %v947_v35 }
  0xed   : > { %950 = vmatprep.subr.bf16.mxu1 %v949_v38 }
  0xee   : > { %418 = vmatmul.mubr.f32.gmra.mrb[2].mxu0 %v310_v0 }
 0x1bd   : > { %v414_v40 = vpop.f32.mrb[0].mxu0 }
 0x1be   : > { %v415_v41 = vadd.f32 %v779_v39, %v414_v40  ;;  %v416_v42 = vpop.f32.mrb[1].mxu0 }
 0x1c0   : > { %v423_v43 = vmax.f32 %v415_v41, 0.0 }
 0x1c1   : > { %v419_v44 = vpop.f32.mrb[2].mxu0 }
 0x1c2   : > { %v429_v45 = vrot.slane %v423_v43, 7  ;;  %v420_v46 = vadd.f32 %v779_v39, %v419_v44  ;;  %570 = vmatprep.mubr.f32.mxu1 %v423_v43  ;;  %v421_v47 = vpop.f32.mrb[3].mxu0  ;;  %v437_v49 = vrot.slane %v423_v43, 1 }
 0x1c4   : > { %434 = vst [vmem:[#allocation3] sm:$0xfe] %v429_v45  ;;  %v424_v48 = vmax.f32 %v420_v46, 0.0 }
 0x1c6   : > { %v430_v50 = vrot.slane %v424_v48, 7  ;;  %v438_v51 = vrot.slane %v424_v48, 1 }
 0x1c8   : > { %v431_v54 = vsel %vm285_vm1, %v429_v45, %v430_v50  ;;  %v439_v55 = vsel %vm297_vm2, %v437_v49, %v438_v51  ;;  %443 = vst [vmem:[#allocation3 + $0x28] sm:$0x7f] %v438_v51 }
 0x1cb   : > { %v446_v57 = vld [vmem:[#allocation3] sm:$0xff] }
 0x1cc   : > { %571 = vmatmul.mubr.f32.vlgmr.msra.gmra.mrb[0].mxu1 %v446_v57 }
 0x1cd   : > { %952 = vmatpush3.bf16.msra.mxu1 %v949_v38  ;;  %575 = vmatprep.mubr.f32.mxu1 %v424_v48 }
 0x1ce   : > { %954 = vmatprep.subr.bf16.mxu1 %v953_v56 }
 0x1cf   : > { %v451_v17 = vld [vmem:[#allocation3 + $0x28] sm:$0xff] }
 0x1d0   : > { %576 = vmatmul.mubr.f32.gmra.mrb[2].mxu1 %v431_v54 }
 0x1d1   : > { %956 = vmatpush3.bf16.msra.mxu1 %v953_v56  ;;  %878 = vmatprep.mubr.f32.mxu1 %v439_v55 }
 0x1d2   : > { %958 = vmatprep.subr.bf16.mxu1 %v957_v60 }
 0x1d5   : > { %960 = vmatpush3.bf16.msra.mxu1 %v957_v60 }
 0x1d6   : > { %962 = vmatprep.subr.bf16.mxu1 %v961_v63 }
 0x1d9   : > { %964 = vmatpush3.bf16.msra.mxu1 %v961_v63 }
 0x1da   : > { %966 = vmatprep.subr.bf16.mxu1 %v965_v6 }
 0x1dd   : > { %968 = vmatpush3.bf16.msra.mxu1 %v965_v6 }
 0x1de   : > { %970 = vmatprep.subr.bf16.mxu1 %v969_v9 }
 0x1e1   : > { %972 = vmatpush3.bf16.msra.mxu1 %v969_v9 }
 0x1e2   : > { %974 = vmatprep.subr.bf16.mxu1 %v973_v12 }
 0x1e5   : > { %976 = vmatpush3.bf16.msra.mxu1 %v973_v12 }
 0x1e6   : > { %978 = vmatprep.subr.bf16.mxu1 %v977_v16 }
 0x1e9   : > { %980 = vmatpush3.bf16.msra.mxu1 %v977_v16 }
 0x1ec   : > { %879 = vmatmul.mubr.f32.vlgmr.msra.gmra.mrb[4].mxu1 %v451_v17 }
 0x29f   : > { %v822_v18 = vpop.f32.mrb[0].mxu1 }
 0x2a0   : > { %v823_v19 = vpop.f32.mrb[1].mxu1 }
 0x2a1   : > { %v824_v20 = vadd.f32 %v823_v19, %v822_v18 }
 0x2a3   : > { %v825_v21 = vpop.f32.mrb[2].mxu1  ;;  %v573_v5 = vadd.f32 %v824_v20, %v782_v23 }
 0x2a4   : > { %v826_v0 = vpop.f32.mrb[3].mxu1 }
 0x2a5   : > { %v827_v22 = vadd.f32 %v826_v0, %v825_v21 }
 0x2a7   : > { %v578_v24 = vadd.f32 %v827_v22, %v782_v23 }
 0x2bf   : > { %v880_v2 = vpop.f32.mrb[4].mxu1 }
 0x2c0   : > { %v653_v25 = vadd.f32 %v880_v2, %v578_v24  ;;  %v647_v1 = vpop.f32.mrb[5].mxu1 }
 0x2c1   : > { %v648_v26 = vadd.f32 %v647_v1, %v573_v5 }
 0x2c2   : > { %v657_v27 = vmax.f32 %v653_v25, 0.0 }
 0x2c3   : > { %v656_v28 = vmax.f32 %v648_v26, 0.0 }
 0x2c4   : > { %659 = vst [vmem:[%s271_s28 + $0x8] sm:$0xff] %v657_v27 }
 0x2c5   : > { %658 = vst [vmem:[%s271_s28] sm:$0xff] %v656_v28 }
 0x2c6   : > { %1154 = shalt.err (!%p1151_p1)
}
 0x2c7   : > { %s1155_s24 = scalar_lea.hbm %s1501_s17, 256  ;;  %s1159_s16 = scalar_lea.hbm %s1550_s5, 512 }
 0x2c8   : > { %p1156_p13 = scmp.ne.s32.totalorder %s1501_s17, %s1155_s24  ;;  %p1160_p4 = scmp.lt.u32.totalorder %s1501_s17, %s1550_s5 }
 0x2c9   : > { %p1161_p5 = scmp.lt.u32.totalorder %s1159_s16, %s1155_s24  ;;  %p1163_p11 = scmp.lt.u32.totalorder %s1155_s24, %s1501_s17 }
 0x2ca   : > { %p1157_p6 = pnand %p1156_p13, %p1564_p0 }
 0x2cb   : > { %p1162_p8 = por %p1161_p5, %p1160_p4 }
 0x2cc   : > { %p1158_p10 = pneg %p1157_p6 }
 0x2cd   : > { %p1164_p2 = por %p1163_p11, %p1162_p8 }
 0x2cf   : > { %p1165_p3 = pnand %p1164_p2, %p1158_p10 }
 0x2d1   : > { %1168 = shalt.err (!%p1165_p3)
}
 0x2d2   : > { %s1222_s9 = smov 128   ;;  %s1223_s30 = smov 8  }
 0x2d3   : > { %991 = dma.vmem_to_hbm [thread:$0]  (%p1564_p0), %s1496_s13, 256, %s1501_s17, %s661_s7, %s1222_s9, %s1222_s9, %s1223_s30  }
 0x2d4 PF: > { %s689_s11 = sand.u32 1, %s1199_s18   ;;  %p1565_p7 = scmp.ne.s32.totalorder %s1555_s25, 0 }
 0x2d5   : > { %p1566_p9 = scmp.ge.s32.totalorder %s1211_s21, 2  ;;  %s690_s6 = scalar_lea.sflag [#allocation6], %s689_s11 }
 0x2d7   : > { %p1005_p12 = pnand %p1566_p9, %p1565_p7 }
 0x2d9   : > { %1194 = dma.done.wait (!%p1005_p12), %s690_s6, 256  }
 0x2da   : > { %1196 = vsyncadd (!%p1005_p12), %s690_s6, 4294967040  ;;  %p19_p1 = scmp.ge.s32.totalorder %s1370_s29, 4   ;;  %s1567_s18 = smov %s1203_s19 }
 0x2db   : > { %s1568_s19 = smov %s1207_s20  ;;  %s1569_s20 = smov %s1386_s27 }
 0x2dc   : > { %s1570_s21 = smov %s1370_s29  ;;  %21 = sbr.rel (!%p19_p1) target bundleno = 6 (0x6), region = 93 }
 0x2e3   :  { %695 = vsyncpa [#allocation5], 1 }
 0x2e4   :  { %697 = vsyncpa [#allocation5 + $0x1], 1 }
 0x2e5   :  { %698 = vsyncpa [#allocation8], 1 }
 0x2e6   :  { %699 = vsyncpa [#allocation6], 1 }
 0x2e7   :  { %701 = vsyncpa [#allocation6 + $0x1], 1 }

</bundles_post_ra>
